<compile_context>
chip_gen: v7x
topology: tpu7x:2x2x1
jax: 0.10.0
libtpu: 0.0.40
codegen_flags: <defaults>
</compile_context>

<pallas_src>
import functools

import jax
import jax.numpy as jnp
from jax import lax
from jax.experimental import pallas as pl
from jax.experimental.pallas import tpu as pltpu


def _agg0_kernel(x_ref, wdw_ref, wpw_ref, gamma_ref, beta_ref, o_ref,
                 *, H, W, C, G, eps):
    # x_ref:     (1, G*C, H*W)  G batch elements folded on the sublane axis
    # wdw_ref:   (G*C, 9)       depthwise 3x3 weights (tiled per batch),
    #                           tap index = (dh+1)*3 + (dw+1)
    # wpw_ref:   (C, C)         pointwise 1x1 weights, (out, in) layout
    # gamma_ref: (C, 1), beta_ref: (C, 1)   LayerNorm affine params
    # o_ref:     (1, G*C, H*W)  channel-major output slab (lane-dense store)
    HW = H * W
    R = G * C
    x = x_ref[0].astype(jnp.float32)                           # (R, HW)

    # ---- hoisted boundary masks (computed once, reused by all taps) ----
    t = lax.broadcasted_iota(jnp.int32, (R, HW), 1)            # token index
    col = t % W                                                # column in row
    m_left = (col >= 1).astype(jnp.float32)                    # dw == -1 valid
    m_right = (col <= W - 2).astype(jnp.float32)               # dw == +1 valid
    m_up = (t >= W).astype(jnp.float32)                        # dh == -1 valid
    m_down = (t < (H - 1) * W).astype(jnp.float32)             # dh == +1 valid
    col_mask = {-1: m_left, 0: None, 1: m_right}
    row_mask = {-1: m_up, 0: None, 1: m_down}

    wdw = wdw_ref[...].astype(jnp.float32)                     # (R, 9)

    # ---- depthwise 3x3 conv, padding=1 ----
    # Each tap: lane shift (pltpu.roll -> XLU slot) + one FMA against a
    # masked weight plane (mask folded into the per-channel weight broadcast;
    # wrap-around lanes are zeroed by the masks).
    acc = x * wdw[:, 4:5]                                      # center tap
    for dh in (-1, 0, 1):
        for dw in (-1, 0, 1):
            if dh == 0 and dw == 0:
                continue
            k = (dh + 1) * 3 + (dw + 1)
            wcol = wdw[:, k:k + 1]                             # (R, 1)
            mh, mw = row_mask[dh], col_mask[dw]
            if mh is None:
                mask = mw
            elif mw is None:
                mask = mh
            else:
                mask = mh * mw                                 # corner tap
            wplane = wcol * mask                               # (R, HW)
            s = dh * W + dw                                    # flat offset
            shifted = pltpu.roll(x, shift=(-s) % HW, axis=1)   # shifted[t]=x[t+s]
            acc = acc + shifted * wplane

    # ---- pointwise 1x1 conv + LayerNorm(C) + Hardswish, per batch group ----
    wpw = wpw_ref[...].astype(jnp.float32)                     # (C_out, C_in)
    gamma = gamma_ref[...].astype(jnp.float32)                 # (C, 1)
    beta = beta_ref[...].astype(jnp.float32)                   # (C, 1)
    inv_c = 1.0 / C

    outs = []
    for g in range(G):                                         # trace-time unroll
        a = acc[g * C:(g + 1) * C, :]                          # (C, HW)
        if C <= 32:
            # Degenerate matmul shape for the MXU -> C broadcast FMAs (VPU).
            y = wpw[:, 0:1] * a[0:1, :]
            for ci in range(1, C):
                y = y + wpw[:, ci:ci + 1] * a[ci:ci + 1, :]
        else:
            # Big-C path: bf16 operands on the MXU, f32 accumulation.
            y = jnp.dot(wpw.astype(jnp.bfloat16), a.astype(jnp.bfloat16),
                        preferred_element_type=jnp.float32)

        # LayerNorm over channels (sublane axis), two-pass variance.
        mean = jnp.sum(y, axis=0, keepdims=True) * inv_c       # (1, HW)
        yc = y - mean
        var = jnp.sum(yc * yc, axis=0, keepdims=True) * inv_c
        yn = yc * lax.rsqrt(var + eps) * gamma + beta

        # Hardswish: x * relu6(x + 3) / 6
        outs.append(yn * jnp.clip(yn + 3.0, 0.0, 6.0) * (1.0 / 6.0))

    out = outs[0] if G == 1 else jnp.concatenate(outs, axis=0)  # (R, HW)
    o_ref[0] = out.astype(o_ref.dtype)


def agg0_forward(x_nchw, w_dw, w_pw, gamma, beta, *, eps=1e-5,
                 return_channel_major=False):
    """x_nchw: (B, C, H, W); w_dw: (C, 1, 3, 3); w_pw: (C, C, 1, 1)."""
    B, C, H, W = x_nchw.shape
    HW = H * W

    # Fold as many batch elements as fit into the 8-sublane vreg dimension.
    G = min(B, max(1, 8 // C))
    while B % G != 0:        # keep the fold exact (small B, so this is cheap)
        G -= 1
    n_groups = B // G
    R = G * C

    # ---- glue: only free reshapes / tiny weight tiling, no HBM transpose ----
    x_fold = x_nchw.reshape(n_groups, R, HW)      # (n_groups, G*C, H*W), free
    w_dw_k = jnp.tile(w_dw.reshape(C, 9), (G, 1))  # (G*C, 9), row r -> chan r%C
    w_pw_k = w_pw[:, :, 0, 0]                      # (C_out, C_in)
    gamma2 = gamma.reshape(C, 1)
    beta2 = beta.reshape(C, 1)

    kernel = functools.partial(_agg0_kernel, H=H, W=W, C=C, G=G, eps=eps)

    out_fold = pl.pallas_call(
        kernel,
        out_shape=jax.ShapeDtypeStruct((n_groups, R, HW), x_nchw.dtype),
        grid_spec=pltpu.PrefetchScalarGridSpec(
            num_scalar_prefetch=0,
            grid=(n_groups,),
            in_specs=[
                pl.BlockSpec((1, R, HW), lambda g: (g, 0, 0)),
                pl.BlockSpec((R, 9), lambda g: (0, 0)),
                pl.BlockSpec((C, C), lambda g: (0, 0)),
                pl.BlockSpec((C, 1), lambda g: (0, 0)),
                pl.BlockSpec((C, 1), lambda g: (0, 0)),
            ],
            out_specs=pl.BlockSpec((1, R, HW), lambda g: (g, 0, 0)),
        ),
        compiler_params=pltpu.CompilerParams(
            dimension_semantics=("arbitrary",)),
    )(x_fold, w_dw_k, w_pw_k, gamma2, beta2)

    out_cm = out_fold.reshape(B, C, HW)            # channel-major (B, C, H*W)
    if return_channel_major:
        # Layout-preserving path for channel-major consumers (no extra HBM
        # round trip / 4-lane padded layout).
        return out_cm
    # Single small transpose to the PyTorch token-major output layout.
    return jnp.transpose(out_cm, (0, 2, 1))        # (B, H*W, C)


def agg0_reference(x_nchw, w_dw, w_pw, gamma, beta, *, eps=1e-5):
    """Pure-JAX reference mirroring the PyTorch module."""
    B, C, H, W = x_nchw.shape
    # depthwise 3x3, pad 1, groups=C
    y = lax.conv_general_dilated(
        x_nchw, w_dw, window_strides=(1, 1), padding=((1, 1), (1, 1)),
        dimension_numbers=("NCHW", "OIHW", "NCHW"), feature_group_count=C)
    # pointwise 1x1
    y = lax.conv_general_dilated(
        y, w_pw, window_strides=(1, 1), padding=((0, 0), (0, 0)),
        dimension_numbers=("NCHW", "OIHW", "NCHW"))
    # (B, C, H*W) -> (B, H*W, C)
    y = jnp.transpose(y.reshape(B, C, H * W), (0, 2, 1))
    mean = jnp.mean(y, axis=-1, keepdims=True)
    var = jnp.mean((y - mean) ** 2, axis=-1, keepdims=True)
    yn = (y - mean) * lax.rsqrt(var + eps) * gamma + beta
    return yn * jnp.clip(yn + 3.0, 0.0, 6.0) / 6.0


if __name__ == "__main__":
    key = jax.random.PRNGKey(0)
    B, C, H, W = 2, 4, 16, 16     # C == seg_dim

    k_x, k_dw, k_pw = jax.random.split(key, 3)
    x = jax.random.normal(k_x, (B, C, H, W), dtype=jnp.float32)

    # Deterministic synthetic parameters (shapes from the module __init__).
    w_dw = jax.random.normal(k_dw, (C, 1, 3, 3), dtype=jnp.float32) * 0.2
    w_pw = jax.random.normal(k_pw, (C, C, 1, 1), dtype=jnp.float32) * 0.2
    gamma = jnp.ones((C,), jnp.float32)        # LayerNorm weight init
    beta = jnp.zeros((C,), jnp.float32)        # LayerNorm bias init

    out = agg0_forward(x, w_dw, w_pw, gamma, beta)
    out = jax.block_until_ready(out)

    ref = agg0_reference(x, w_dw, w_pw, gamma, beta)
    assert out.shape == (B, H * W, C)
    assert jnp.allclose(out, ref, atol=1e-4, rtol=1e-4), "mismatch vs reference"

    print("KERNEL_OK")
</pallas_src>

<mosaic_0001>
module attributes {stable_mosaic.version = 11 : i64} {
  func.func @_agg0_kernel(%arg0: i32, %arg1: memref<1x8x256xf32, #tpu.memory_space<vmem>>, %arg2: memref<8x9xf32, #tpu.memory_space<vmem>>, %arg3: memref<4x4xf32, #tpu.memory_space<vmem>>, %arg4: memref<4x1xf32, #tpu.memory_space<vmem>>, %arg5: memref<4x1xf32, #tpu.memory_space<vmem>>, %arg6: memref<1x8x256xf32, #tpu.memory_space<vmem>>) attributes {dimension_semantics = [#tpu.dimension_semantics<arbitrary>], iteration_bounds = array<i64: 1>, scalar_prefetch = 0 : i64, scratch_operands = 0 : i64, tpu.core_type = #tpu.core_type<tc>, window_params = [{transform_indices = @transform_0, window_bounds = array<i64: 1, 8, 256>}, {pipeline_mode = #tpu.pipeline_mode<synchronous>, transform_indices = @transform_1, window_bounds = array<i64: 8, 9>}, {pipeline_mode = #tpu.pipeline_mode<synchronous>, transform_indices = @transform_2, window_bounds = array<i64: 4, 4>}, {pipeline_mode = #tpu.pipeline_mode<synchronous>, transform_indices = @transform_3, window_bounds = array<i64: 4, 1>}, {pipeline_mode = #tpu.pipeline_mode<synchronous>, transform_indices = @transform_4, window_bounds = array<i64: 4, 1>}, {transform_indices = @transform_5, window_bounds = array<i64: 1, 8, 256>}]} {
    %c0 = arith.constant 0 : index
    %c0_0 = arith.constant 0 : index
    %c0_1 = arith.constant 0 : index
    %0 = vector.load %arg1[%c0, %c0_0, %c0_1] : memref<1x8x256xf32, #tpu.memory_space<vmem>>, vector<1x8x256xf32>
    %1 = vector.shape_cast %0 : vector<1x8x256xf32> to vector<8x256xf32>
    %2 = tpu.iota {dimensions = array<i32: 1>} : vector<8x256xi32>
    %c16_i32 = arith.constant 16 : i32
    %c0_i32 = arith.constant 0 : i32
    %3 = arith.cmpi eq, %c16_i32, %c0_i32 : i32
    %c1_i32 = arith.constant 1 : i32
    %4 = arith.select %3, %c1_i32, %c16_i32 : i32
    %5 = vector.broadcast %4 : i32 to vector<8x256xi32>
    %6 = arith.remsi %2, %5 : vector<8x256xi32>
    %c0_i32_2 = arith.constant 0 : i32
    %7 = vector.broadcast %c0_i32_2 : i32 to vector<8x256xi32>
    %8 = arith.cmpi ne, %6, %7 : vector<8x256xi32>
    %c0_i32_3 = arith.constant 0 : i32
    %9 = vector.broadcast %c0_i32_3 : i32 to vector<8x256xi32>
    %10 = arith.cmpi slt, %6, %9 : vector<8x256xi32>
    %c0_i32_4 = arith.constant 0 : i32
    %11 = arith.cmpi slt, %4, %c0_i32_4 : i32
    %12 = vector.broadcast %11 : i1 to vector<8x256xi1>
    %13 = vector.broadcast %12 : vector<8x256xi1> to vector<8x256xi1>
    %14 = arith.xori %10, %13 : vector<8x256xi1>
    %15 = arith.andi %14, %8 : vector<8x256xi1>
    %16 = vector.broadcast %4 : i32 to vector<8x256xi32>
    %17 = arith.addi %6, %16 : vector<8x256xi32>
    %18 = arith.select %15, %17, %6 : vector<8x256xi1>, vector<8x256xi32>
    %c1_i32_5 = arith.constant 1 : i32
    %19 = vector.broadcast %c1_i32_5 : i32 to vector<8x256xi32>
    %20 = arith.cmpi sge, %18, %19 : vector<8x256xi32>
    %21 = arith.extui %20 : vector<8x256xi1> to vector<8x256xi32>
    %22 = arith.sitofp %21 : vector<8x256xi32> to vector<8x256xf32>
    %c14_i32 = arith.constant 14 : i32
    %23 = vector.broadcast %c14_i32 : i32 to vector<8x256xi32>
    %24 = arith.cmpi sle, %18, %23 : vector<8x256xi32>
    %25 = arith.extui %24 : vector<8x256xi1> to vector<8x256xi32>
    %26 = arith.sitofp %25 : vector<8x256xi32> to vector<8x256xf32>
    %c16_i32_6 = arith.constant 16 : i32
    %27 = vector.broadcast %c16_i32_6 : i32 to vector<8x256xi32>
    %28 = arith.cmpi sge, %2, %27 : vector<8x256xi32>
    %29 = arith.extui %28 : vector<8x256xi1> to vector<8x256xi32>
    %30 = arith.sitofp %29 : vector<8x256xi32> to vector<8x256xf32>
    %c240_i32 = arith.constant 240 : i32
    %31 = vector.broadcast %c240_i32 : i32 to vector<8x256xi32>
    %32 = arith.cmpi slt, %2, %31 : vector<8x256xi32>
    %33 = arith.extui %32 : vector<8x256xi1> to vector<8x256xi32>
    %34 = arith.sitofp %33 : vector<8x256xi32> to vector<8x256xf32>
    %c0_7 = arith.constant 0 : index
    %c0_8 = arith.constant 0 : index
    %35 = vector.load %arg2[%c0_7, %c0_8] : memref<8x9xf32, #tpu.memory_space<vmem>>, vector<8x9xf32>
    %36 = vector.extract_strided_slice %35 {offsets = [0, 4], sizes = [8, 1], strides = [1, 1]} : vector<8x9xf32> to vector<8x1xf32>
    %37 = vector.broadcast %36 : vector<8x1xf32> to vector<8x256xf32>
    %38 = arith.mulf %1, %37 : vector<8x256xf32>
    %39 = vector.extract_strided_slice %35 {offsets = [0, 0], sizes = [8, 1], strides = [1, 1]} : vector<8x9xf32> to vector<8x1xf32>
    %40 = arith.mulf %30, %22 : vector<8x256xf32>
    %41 = vector.broadcast %39 : vector<8x1xf32> to vector<8x256xf32>
    %42 = arith.mulf %41, %40 : vector<8x256xf32>
    %c17_i32 = arith.constant 17 : i32
    %43 = tpu.dynamic_rotate %1 by %c17_i32 dim 1 : vector<8x256xf32>, i32 -> vector<8x256xf32>
    %44 = arith.mulf %43, %42 : vector<8x256xf32>
    %45 = arith.addf %38, %44 : vector<8x256xf32>
    %46 = vector.extract_strided_slice %35 {offsets = [0, 1], sizes = [8, 1], strides = [1, 1]} : vector<8x9xf32> to vector<8x1xf32>
    %47 = vector.broadcast %46 : vector<8x1xf32> to vector<8x256xf32>
    %48 = arith.mulf %47, %30 : vector<8x256xf32>
    %c16_i32_9 = arith.constant 16 : i32
    %49 = tpu.dynamic_rotate %1 by %c16_i32_9 dim 1 : vector<8x256xf32>, i32 -> vector<8x256xf32>
    %50 = arith.mulf %49, %48 : vector<8x256xf32>
    %51 = arith.addf %45, %50 : vector<8x256xf32>
    %52 = vector.extract_strided_slice %35 {offsets = [0, 2], sizes = [8, 1], strides = [1, 1]} : vector<8x9xf32> to vector<8x1xf32>
    %53 = arith.mulf %30, %26 : vector<8x256xf32>
    %54 = vector.broadcast %52 : vector<8x1xf32> to vector<8x256xf32>
    %55 = arith.mulf %54, %53 : vector<8x256xf32>
    %c15_i32 = arith.constant 15 : i32
    %56 = tpu.dynamic_rotate %1 by %c15_i32 dim 1 : vector<8x256xf32>, i32 -> vector<8x256xf32>
    %57 = arith.mulf %56, %55 : vector<8x256xf32>
    %58 = arith.addf %51, %57 : vector<8x256xf32>
    %59 = vector.extract_strided_slice %35 {offsets = [0, 3], sizes = [8, 1], strides = [1, 1]} : vector<8x9xf32> to vector<8x1xf32>
    %60 = vector.broadcast %59 : vector<8x1xf32> to vector<8x256xf32>
    %61 = arith.mulf %60, %22 : vector<8x256xf32>
    %c1_i32_10 = arith.constant 1 : i32
    %62 = tpu.dynamic_rotate %1 by %c1_i32_10 dim 1 : vector<8x256xf32>, i32 -> vector<8x256xf32>
    %63 = arith.mulf %62, %61 : vector<8x256xf32>
    %64 = arith.addf %58, %63 : vector<8x256xf32>
    %65 = vector.extract_strided_slice %35 {offsets = [0, 5], sizes = [8, 1], strides = [1, 1]} : vector<8x9xf32> to vector<8x1xf32>
    %66 = vector.broadcast %65 : vector<8x1xf32> to vector<8x256xf32>
    %67 = arith.mulf %66, %26 : vector<8x256xf32>
    %c255_i32 = arith.constant 255 : i32
    %68 = tpu.dynamic_rotate %1 by %c255_i32 dim 1 : vector<8x256xf32>, i32 -> vector<8x256xf32>
    %69 = arith.mulf %68, %67 : vector<8x256xf32>
    %70 = arith.addf %64, %69 : vector<8x256xf32>
    %71 = vector.extract_strided_slice %35 {offsets = [0, 6], sizes = [8, 1], strides = [1, 1]} : vector<8x9xf32> to vector<8x1xf32>
    %72 = arith.mulf %34, %22 : vector<8x256xf32>
    %73 = vector.broadcast %71 : vector<8x1xf32> to vector<8x256xf32>
    %74 = arith.mulf %73, %72 : vector<8x256xf32>
    %c241_i32 = arith.constant 241 : i32
    %75 = tpu.dynamic_rotate %1 by %c241_i32 dim 1 : vector<8x256xf32>, i32 -> vector<8x256xf32>
    %76 = arith.mulf %75, %74 : vector<8x256xf32>
    %77 = arith.addf %70, %76 : vector<8x256xf32>
    %78 = vector.extract_strided_slice %35 {offsets = [0, 7], sizes = [8, 1], strides = [1, 1]} : vector<8x9xf32> to vector<8x1xf32>
    %79 = vector.broadcast %78 : vector<8x1xf32> to vector<8x256xf32>
    %80 = arith.mulf %79, %34 : vector<8x256xf32>
    %c240_i32_11 = arith.constant 240 : i32
    %81 = tpu.dynamic_rotate %1 by %c240_i32_11 dim 1 : vector<8x256xf32>, i32 -> vector<8x256xf32>
    %82 = arith.mulf %81, %80 : vector<8x256xf32>
    %83 = arith.addf %77, %82 : vector<8x256xf32>
    %84 = vector.extract_strided_slice %35 {offsets = [0, 8], sizes = [8, 1], strides = [1, 1]} : vector<8x9xf32> to vector<8x1xf32>
    %85 = arith.mulf %34, %26 : vector<8x256xf32>
    %86 = vector.broadcast %84 : vector<8x1xf32> to vector<8x256xf32>
    %87 = arith.mulf %86, %85 : vector<8x256xf32>
    %c239_i32 = arith.constant 239 : i32
    %88 = tpu.dynamic_rotate %1 by %c239_i32 dim 1 : vector<8x256xf32>, i32 -> vector<8x256xf32>
    %89 = arith.mulf %88, %87 : vector<8x256xf32>
    %90 = arith.addf %83, %89 : vector<8x256xf32>
    %c0_12 = arith.constant 0 : index
    %c0_13 = arith.constant 0 : index
    %91 = vector.load %arg3[%c0_12, %c0_13] : memref<4x4xf32, #tpu.memory_space<vmem>>, vector<4x4xf32>
    %c0_14 = arith.constant 0 : index
    %c0_15 = arith.constant 0 : index
    %92 = vector.load %arg4[%c0_14, %c0_15] : memref<4x1xf32, #tpu.memory_space<vmem>>, vector<4x1xf32>
    %c0_16 = arith.constant 0 : index
    %c0_17 = arith.constant 0 : index
    %93 = vector.load %arg5[%c0_16, %c0_17] : memref<4x1xf32, #tpu.memory_space<vmem>>, vector<4x1xf32>
    %94 = vector.extract_strided_slice %90 {offsets = [0, 0], sizes = [4, 256], strides = [1, 1]} : vector<8x256xf32> to vector<4x256xf32>
    %95 = vector.extract_strided_slice %91 {offsets = [0, 0], sizes = [4, 1], strides = [1, 1]} : vector<4x4xf32> to vector<4x1xf32>
    %96 = vector.extract_strided_slice %94 {offsets = [0, 0], sizes = [1, 256], strides = [1, 1]} : vector<4x256xf32> to vector<1x256xf32>
    %97 = vector.broadcast %95 : vector<4x1xf32> to vector<4x256xf32>
    %98 = vector.broadcast %96 : vector<1x256xf32> to vector<4x256xf32>
    %99 = arith.mulf %97, %98 : vector<4x256xf32>
    %100 = vector.extract_strided_slice %91 {offsets = [0, 1], sizes = [4, 1], strides = [1, 1]} : vector<4x4xf32> to vector<4x1xf32>
    %101 = vector.extract_strided_slice %94 {offsets = [1, 0], sizes = [1, 256], strides = [1, 1]} : vector<4x256xf32> to vector<1x256xf32>
    %102 = vector.broadcast %100 : vector<4x1xf32> to vector<4x256xf32>
    %103 = vector.broadcast %101 : vector<1x256xf32> to vector<4x256xf32>
    %104 = arith.mulf %102, %103 : vector<4x256xf32>
    %105 = arith.addf %99, %104 : vector<4x256xf32>
    %106 = vector.extract_strided_slice %91 {offsets = [0, 2], sizes = [4, 1], strides = [1, 1]} : vector<4x4xf32> to vector<4x1xf32>
    %107 = vector.extract_strided_slice %94 {offsets = [2, 0], sizes = [1, 256], strides = [1, 1]} : vector<4x256xf32> to vector<1x256xf32>
    %108 = vector.broadcast %106 : vector<4x1xf32> to vector<4x256xf32>
    %109 = vector.broadcast %107 : vector<1x256xf32> to vector<4x256xf32>
    %110 = arith.mulf %108, %109 : vector<4x256xf32>
    %111 = arith.addf %105, %110 : vector<4x256xf32>
    %112 = vector.extract_strided_slice %91 {offsets = [0, 3], sizes = [4, 1], strides = [1, 1]} : vector<4x4xf32> to vector<4x1xf32>
    %113 = vector.extract_strided_slice %94 {offsets = [3, 0], sizes = [1, 256], strides = [1, 1]} : vector<4x256xf32> to vector<1x256xf32>
    %114 = vector.broadcast %112 : vector<4x1xf32> to vector<4x256xf32>
    %115 = vector.broadcast %113 : vector<1x256xf32> to vector<4x256xf32>
    %116 = arith.mulf %114, %115 : vector<4x256xf32>
    %117 = arith.addf %111, %116 : vector<4x256xf32>
    %cst = arith.constant dense<0.000000e+00> : vector<256xf32>
    %118 = vector.multi_reduction <add>, %117, %cst [0] : vector<4x256xf32> to vector<256xf32>
    %119 = vector.shape_cast %118 : vector<256xf32> to vector<1x256xf32>
    %cst_18 = arith.constant 2.500000e-01 : f32
    %120 = vector.broadcast %cst_18 : f32 to vector<1x256xf32>
    %121 = arith.mulf %119, %120 : vector<1x256xf32>
    %122 = vector.broadcast %121 : vector<1x256xf32> to vector<4x256xf32>
    %123 = arith.subf %117, %122 : vector<4x256xf32>
    %124 = arith.mulf %123, %123 : vector<4x256xf32>
    %cst_19 = arith.constant dense<0.000000e+00> : vector<256xf32>
    %125 = vector.multi_reduction <add>, %124, %cst_19 [0] : vector<4x256xf32> to vector<256xf32>
    %126 = vector.shape_cast %125 : vector<256xf32> to vector<1x256xf32>
    %cst_20 = arith.constant 2.500000e-01 : f32
    %127 = vector.broadcast %cst_20 : f32 to vector<1x256xf32>
    %128 = arith.mulf %126, %127 : vector<1x256xf32>
    %cst_21 = arith.constant 9.99999974E-6 : f32
    %129 = vector.broadcast %cst_21 : f32 to vector<1x256xf32>
    %130 = arith.addf %128, %129 : vector<1x256xf32>
    %131 = math.rsqrt %130 : vector<1x256xf32>
    %132 = vector.broadcast %131 : vector<1x256xf32> to vector<4x256xf32>
    %133 = arith.mulf %123, %132 : vector<4x256xf32>
    %134 = vector.broadcast %92 : vector<4x1xf32> to vector<4x256xf32>
    %135 = arith.mulf %133, %134 : vector<4x256xf32>
    %136 = vector.broadcast %93 : vector<4x1xf32> to vector<4x256xf32>
    %137 = arith.addf %135, %136 : vector<4x256xf32>
    %cst_22 = arith.constant 3.000000e+00 : f32
    %138 = vector.broadcast %cst_22 : f32 to vector<4x256xf32>
    %139 = arith.addf %137, %138 : vector<4x256xf32>
    %cst_23 = arith.constant 0.000000e+00 : f32
    %cst_24 = arith.constant 6.000000e+00 : f32
    %140 = vector.broadcast %cst_23 : f32 to vector<4x256xf32>
    %141 = arith.maximumf %140, %139 : vector<4x256xf32>
    %142 = vector.broadcast %cst_24 : f32 to vector<4x256xf32>
    %143 = arith.minimumf %142, %141 : vector<4x256xf32>
    %144 = arith.mulf %137, %143 : vector<4x256xf32>
    %cst_25 = arith.constant 0.166666672 : f32
    %145 = vector.broadcast %cst_25 : f32 to vector<4x256xf32>
    %146 = arith.mulf %144, %145 : vector<4x256xf32>
    %147 = vector.extract_strided_slice %90 {offsets = [4, 0], sizes = [4, 256], strides = [1, 1]} : vector<8x256xf32> to vector<4x256xf32>
    %148 = vector.extract_strided_slice %91 {offsets = [0, 0], sizes = [4, 1], strides = [1, 1]} : vector<4x4xf32> to vector<4x1xf32>
    %149 = vector.extract_strided_slice %147 {offsets = [0, 0], sizes = [1, 256], strides = [1, 1]} : vector<4x256xf32> to vector<1x256xf32>
    %150 = vector.broadcast %148 : vector<4x1xf32> to vector<4x256xf32>
    %151 = vector.broadcast %149 : vector<1x256xf32> to vector<4x256xf32>
    %152 = arith.mulf %150, %151 : vector<4x256xf32>
    %153 = vector.extract_strided_slice %91 {offsets = [0, 1], sizes = [4, 1], strides = [1, 1]} : vector<4x4xf32> to vector<4x1xf32>
    %154 = vector.extract_strided_slice %147 {offsets = [1, 0], sizes = [1, 256], strides = [1, 1]} : vector<4x256xf32> to vector<1x256xf32>
    %155 = vector.broadcast %153 : vector<4x1xf32> to vector<4x256xf32>
    %156 = vector.broadcast %154 : vector<1x256xf32> to vector<4x256xf32>
    %157 = arith.mulf %155, %156 : vector<4x256xf32>
    %158 = arith.addf %152, %157 : vector<4x256xf32>
    %159 = vector.extract_strided_slice %91 {offsets = [0, 2], sizes = [4, 1], strides = [1, 1]} : vector<4x4xf32> to vector<4x1xf32>
    %160 = vector.extract_strided_slice %147 {offsets = [2, 0], sizes = [1, 256], strides = [1, 1]} : vector<4x256xf32> to vector<1x256xf32>
    %161 = vector.broadcast %159 : vector<4x1xf32> to vector<4x256xf32>
    %162 = vector.broadcast %160 : vector<1x256xf32> to vector<4x256xf32>
    %163 = arith.mulf %161, %162 : vector<4x256xf32>
    %164 = arith.addf %158, %163 : vector<4x256xf32>
    %165 = vector.extract_strided_slice %91 {offsets = [0, 3], sizes = [4, 1], strides = [1, 1]} : vector<4x4xf32> to vector<4x1xf32>
    %166 = vector.extract_strided_slice %147 {offsets = [3, 0], sizes = [1, 256], strides = [1, 1]} : vector<4x256xf32> to vector<1x256xf32>
    %167 = vector.broadcast %165 : vector<4x1xf32> to vector<4x256xf32>
    %168 = vector.broadcast %166 : vector<1x256xf32> to vector<4x256xf32>
    %169 = arith.mulf %167, %168 : vector<4x256xf32>
    %170 = arith.addf %164, %169 : vector<4x256xf32>
    %cst_26 = arith.constant dense<0.000000e+00> : vector<256xf32>
    %171 = vector.multi_reduction <add>, %170, %cst_26 [0] : vector<4x256xf32> to vector<256xf32>
    %172 = vector.shape_cast %171 : vector<256xf32> to vector<1x256xf32>
    %cst_27 = arith.constant 2.500000e-01 : f32
    %173 = vector.broadcast %cst_27 : f32 to vector<1x256xf32>
    %174 = arith.mulf %172, %173 : vector<1x256xf32>
    %175 = vector.broadcast %174 : vector<1x256xf32> to vector<4x256xf32>
    %176 = arith.subf %170, %175 : vector<4x256xf32>
    %177 = arith.mulf %176, %176 : vector<4x256xf32>
    %cst_28 = arith.constant dense<0.000000e+00> : vector<256xf32>
    %178 = vector.multi_reduction <add>, %177, %cst_28 [0] : vector<4x256xf32> to vector<256xf32>
    %179 = vector.shape_cast %178 : vector<256xf32> to vector<1x256xf32>
    %cst_29 = arith.constant 2.500000e-01 : f32
    %180 = vector.broadcast %cst_29 : f32 to vector<1x256xf32>
    %181 = arith.mulf %179, %180 : vector<1x256xf32>
    %cst_30 = arith.constant 9.99999974E-6 : f32
    %182 = vector.broadcast %cst_30 : f32 to vector<1x256xf32>
    %183 = arith.addf %181, %182 : vector<1x256xf32>
    %184 = math.rsqrt %183 : vector<1x256xf32>
    %185 = vector.broadcast %184 : vector<1x256xf32> to vector<4x256xf32>
    %186 = arith.mulf %176, %185 : vector<4x256xf32>
    %187 = vector.broadcast %92 : vector<4x1xf32> to vector<4x256xf32>
    %188 = arith.mulf %186, %187 : vector<4x256xf32>
    %189 = vector.broadcast %93 : vector<4x1xf32> to vector<4x256xf32>
    %190 = arith.addf %188, %189 : vector<4x256xf32>
    %cst_31 = arith.constant 3.000000e+00 : f32
    %191 = vector.broadcast %cst_31 : f32 to vector<4x256xf32>
    %192 = arith.addf %190, %191 : vector<4x256xf32>
    %cst_32 = arith.constant 0.000000e+00 : f32
    %cst_33 = arith.constant 6.000000e+00 : f32
    %193 = vector.broadcast %cst_32 : f32 to vector<4x256xf32>
    %194 = arith.maximumf %193, %192 : vector<4x256xf32>
    %195 = vector.broadcast %cst_33 : f32 to vector<4x256xf32>
    %196 = arith.minimumf %195, %194 : vector<4x256xf32>
    %197 = arith.mulf %190, %196 : vector<4x256xf32>
    %cst_34 = arith.constant 0.166666672 : f32
    %198 = vector.broadcast %cst_34 : f32 to vector<4x256xf32>
    %199 = arith.mulf %197, %198 : vector<4x256xf32>
    %200 = tpu.concatenate %146, %199 in 0 : vector<4x256xf32>, vector<4x256xf32> -> vector<8x256xf32>
    %c0_35 = arith.constant 0 : index
    %c0_36 = arith.constant 0 : index
    %c0_37 = arith.constant 0 : index
    %201 = vector.load %arg6[%c0_35, %c0_36, %c0_37] : memref<1x8x256xf32, #tpu.memory_space<vmem>>, vector<1x8x256xf32>
    %202 = vector.shape_cast %201 : vector<1x8x256xf32> to vector<8x256xf32>
    %203 = vector.shape_cast %200 : vector<8x256xf32> to vector<1x8x256xf32>
    tpu.vector_store %arg6[%c0_35, %c0_36, %c0_37], %203 {strides = array<i32>} : memref<1x8x256xf32, #tpu.memory_space<vmem>>, vector<1x8x256xf32>,
    return
  }
  func.func @transform_0(%arg0: i32) -> (i32, i32, i32) {
    %c0_i32 = arith.constant 0 : i32
    %c0_i32_0 = arith.constant 0 : i32
    %c0_i32_1 = arith.constant 0 : i32
    return %arg0, %c0_i32, %c0_i32_0 : i32, i32, i32
  }
  func.func @transform_1(%arg0: i32) -> (i32, i32) {
    %c0_i32 = arith.constant 0 : i32
    %c0_i32_0 = arith.constant 0 : i32
    %c0_i32_1 = arith.constant 0 : i32
    return %c0_i32, %c0_i32_0 : i32, i32
  }
  func.func @transform_2(%arg0: i32) -> (i32, i32) {
    %c0_i32 = arith.constant 0 : i32
    %c0_i32_0 = arith.constant 0 : i32
    %c0_i32_1 = arith.constant 0 : i32
    return %c0_i32, %c0_i32_0 : i32, i32
  }
  func.func @transform_3(%arg0: i32) -> (i32, i32) {
    %c0_i32 = arith.constant 0 : i32
    %c0_i32_0 = arith.constant 0 : i32
    %c0_i32_1 = arith.constant 0 : i32
    return %c0_i32, %c0_i32_0 : i32, i32
  }
  func.func @transform_4(%arg0: i32) -> (i32, i32) {
    %c0_i32 = arith.constant 0 : i32
    %c0_i32_0 = arith.constant 0 : i32
    %c0_i32_1 = arith.constant 0 : i32
    return %c0_i32, %c0_i32_0 : i32, i32
  }
  func.func @transform_5(%arg0: i32) -> (i32, i32, i32) {
    %c0_i32 = arith.constant 0 : i32
    %c0_i32_0 = arith.constant 0 : i32
    %c0_i32_1 = arith.constant 0 : i32
    return %arg0, %c0_i32, %c0_i32_0 : i32, i32, i32
  }
}

</mosaic_0001>

<bundles_post_ra>
// kernel: tpu_custom_call.1
= control target key start
LH: loop header
LB: loop body
LE: loop exit
PB: predicated region body
PF: predicated region fallthrough
CT: control target
= control target key end

     0   :  { %10 = vsyncpa [#allocation3], 0  ;;  %s769_s0 = inlined_call_operand.hbm [shape: f32[1,8,256], index: 0, kind: input, shape index: {}]   ;;  %s770_s1 = inlined_call_operand.vmem [shape: f32[8,9], index: 1, kind: input, shape index: {}]   ;;  %s771_s2 = inlined_call_operand.vmem [shape: f32[4,4], index: 2, kind: input, shape index: {}]   ;;  %s772_s3 = inlined_call_operand.vmem [shape: f32[4,1], index: 3, kind: input, shape index: {}]   ;;  %s773_s4 = inlined_call_operand.vmem [shape: f32[4,1], index: 4, kind: input, shape index: {}]   ;;  %s774_s5 = inlined_call_operand.hbm [shape: f32[1,8,256], index: 5, kind: output, shape index: {}]  }
   0x1   :  { %11 = vsyncpa [#allocation4], 0  ;;  %s595_s18 = smov [#allocation2]   ;;  %s547_s22 = scalar_lea.hbm %s769_s0, 256 }
   0x2   :  { %s18_s19 = sshll.u32 %s595_s18, 4  ;;  %p548_p0 = scmp.ne.s32.totalorder %s769_s0, %s547_s22  ;;  %s19_s19 = int_to_ptr.vmem [resolvable:$true] %s18_s19 }
   0x3   :  { %p551_p1 = scmp.lt.u32.totalorder %s547_s22, %s769_s0 }
   0x5   :  { %p553_p2 = pnand %p551_p1, %p548_p0 }
   0x7   :  { %556 = shalt.err (!%p553_p2)
}
   0x8   :  { %s557_s27 = scalar_lea.vmem %s19_s19, 256  ;;  %p562_p4 = scmp.lt.s32.totalorder %s19_s19, %s19_s19 }
   0x9   :  { %p558_p3 = scmp.ne.s32.totalorder %s19_s19, %s557_s27  ;;  %p563_p5 = scmp.lt.s32.totalorder %s557_s27, %s557_s27 }
   0xb   :  { %p564_p6 = por %p563_p5, %p562_p4 }
   0xd   :  { %p565_p7 = pnand %p564_p6, %p558_p3 }
   0xf   :  { %568 = shalt.err (!%p565_p7)
}
  0x10   :  { %21 = dma.hbm_to_vmem [thread:$0]  %s769_s0, 256, %s19_s19, [#allocation3]  }
  0x11   :  { %591 = dma.done.wait [#allocation3], 256  }
  0x12   :  { %592 = vsyncadd [#allocation3], 4294967040  ;;  %v596_v0 = vmov 1   ;;  %v597_v1 = vmov 0   ;;  %v86_v2 = vld [vmem:[%s770_s1] sm:$0xff]  ;;  %v598_v3 = vmov 2   ;;  %v35_v23 = vlaneseq }
  0x13   :  { %526 = vset.pattern.permute.xlu1 %v596_v0  ;;  %524 = vset.pattern.permute.xlu0 %v597_v1  ;;  %v599_v4 = vmov 4   ;;  %v660_v5 = vld [vmem:[#allocation2] sm:$0xff]  ;;  %v600_v6 = vmov 3   ;;  %s601_s0 = smov 17   ;;  %v602_v7 = vmov 5   ;;  %v663_v8 = vld [vmem:[#allocation2 + $0x8] sm:$0xff] }
  0x14   :  { %114 = vperm.xlu1 %526, %v86_v2   ;;  %97 = vperm.xlu0 %524, %v86_v2   ;;  %v603_v9 = vmov 6   ;;  %s604_s1 = smov 16   ;;  %v605_v10 = vmov 7   ;;  %s606_s7 = smov 15   ;;  %v607_v11 = vmov 8   ;;  %v694_v26 = vand.u32 127, %v35_v23 }
  0x15   :  { %s608_s8 = smov 113   ;;  %s609_s9 = smov 1   ;;  %v238_v12 = vld [vmem:[%s771_s2] sm:$0xf]  ;;  %v613_v32 = vmov 0.0   ;;  %vm304_vm14 = vcmask 1043456  }
  0x16   :  { %s610_s10 = smov 112   ;;  %s611_s11 = smov 111   ;;  %v239_v13 = vld [vmem:[%s772_s3] sm:$0xf]  ;;  %v42_v28 = vand.u32 15, %v694_v26  ;;  %v37_v30 = vadd.s32 128, %v694_v26 }
  0x17   :  { %s612_s14 = smov 127   ;;  %v240_v14 = vld [vmem:[%s773_s4] sm:$0xf]  ;;  %vm74_vm1 = vcmp.ge.s32.totalorder %v694_v26, 16  ;;  %vm106_vm5 = vcmp.lt.s32.totalorder %v694_v26, 17  ;;  %vm123_vm7 = vcmp.lt.s32.totalorder %v694_v26, 16 }
  0x18   :  { %527 = vset.pattern.permute.xlu1 %v598_v3  ;;  %525 = vset.pattern.permute.xlu0 %v599_v4  ;;  %vm62_vm0 = vcmp.ge.s32.totalorder %v42_v28, 1  ;;  %v49_v34 = vand.u32 15, %v37_v30  ;;  %v502_v37 = vsel %vm74_vm1, 1.0, %v613_v32  ;;  %vm68_vm2 = vcmp.le.s32.totalorder %v42_v28, 14  ;;  %s614_s3 = smov [#allocation5]  }
  0x19   :  { %133 = vperm.xlu1 %527, %v86_v2   ;;  %89 = vperm.xlu0 %525, %v86_v2   ;;  %v498_v33 = vsel %vm62_vm0, 1.0, %v613_v32  ;;  %vm81_vm4 = vcmp.lt.s32.totalorder %v37_v30, 240  ;;  %v703_v39 = vsel %vm68_vm2, 1.0, %v613_v32  ;;  %vm142_vm8 = vcmp.lt.s32.totalorder %v694_v26, 15  ;;  %s489_s4 = sshll.u32 %s614_s3, 4  ;;  %s490_s4 = int_to_ptr.vmem [resolvable:$true] %s489_s4 }
  0x1a   :  { %vm63_vm3 = vcmp.ge.s32.totalorder %v49_v34, 1  ;;  %v94_v38 = vmul.f32 %v502_v37, %v498_v33  ;;  %vm69_vm6 = vcmp.le.s32.totalorder %v49_v34, 14  ;;  %v503_v42 = vsel %vm81_vm4, 1.0, %v613_v32  ;;  %s569_s18 = scalar_lea.vmem %s490_s4, 256  ;;  %p574_p9 = scmp.lt.s32.totalorder %s490_s4, %s490_s4 }
  0x1b   :  { %v499_v41 = vsel %vm63_vm3, 1.0, %v613_v32  ;;  %v130_v46 = vmul.f32 %v502_v37, %v703_v39  ;;  %v501_v49 = vsel %vm69_vm6, 1.0, %v613_v32  ;;  %vm159_vm9 = vcmp.lt.s32.totalorder %v694_v26, 1  ;;  %p570_p8 = scmp.ne.s32.totalorder %s490_s4, %s569_s18  ;;  %p575_p10 = scmp.lt.s32.totalorder %s569_s18, %s569_s18 }
  0x1c   :  { %v184_v50 = vmul.f32 %v503_v42, %v499_v41  ;;  %vm176_vm10 = vcmp.lt.s32.totalorder %v694_v26, 127  ;;  %vm195_vm11 = vcmp.lt.s32.totalorder %v694_v26, 113  ;;  %vm212_vm12 = vcmp.lt.s32.totalorder %v694_v26, 112 }
  0x1d   :  { %528 = vset.pattern.permute.xlu1 %v600_v6  ;;  %102 = vrot.lane.b32.xlu0 %v660_v5, %s601_s0  ;;  %v220_v34 = vmul.f32 %v503_v42, %v501_v49  ;;  %vm231_vm13 = vcmp.lt.s32.totalorder %v694_v26, 111  ;;  %p576_p11 = por %p575_p10, %p574_p9 }
  0x1e   :  { %150 = vperm.xlu1 %528, %v86_v2   ;;  %529 = vset.pattern.permute.xlu0 %v602_v7 }
  0x1f   :  { %p577_p12 = pnand %p576_p11, %p570_p8 }
  0x21   :  { %167 = vperm.xlu0 %529, %v86_v2  }
  0x22   :  { %104 = vrot.lane.b32.xlu1 %v663_v8, %s601_s0 }
  0x23   :  { %534 = vset.pattern.permute.xlu1 %v596_v0 }
  0x25   :  { %530 = vset.pattern.permute.xlu0 %v603_v9 }
  0x26   :  { %119 = vrot.lane.b32.xlu1 %v660_v5, %s604_s1  ;;  %186 = vperm.xlu0 %530, %v86_v2  }
  0x2a   :  { %121 = vrot.lane.b32.xlu1 %v663_v8, %s604_s1  ;;  %531 = vset.pattern.permute.xlu0 %v605_v10 }
  0x2b   :  { %203 = vperm.xlu0 %531, %v86_v2  }
  0x2e   :  { %138 = vrot.lane.b32.xlu1 %v660_v5, %s606_s7 }
  0x2f   :  { %532 = vset.pattern.permute.xlu0 %v607_v11 }
  0x30   :  { %222 = vperm.xlu0 %532, %v86_v2  }
  0x32   :  { %140 = vrot.lane.b32.xlu1 %v663_v8, %s606_s7 }
  0x34   :  { %191 = vrot.lane.b32.xlu0 %v660_v5, %s608_s8 }
  0x35   :  { %533 = vset.pattern.permute.xlu0 %v597_v1 }
  0x36   :  { %155 = vrot.lane.b32.xlu1 %v660_v5, %s609_s9 }
  0x38   :  { %208 = vrot.lane.b32.xlu0 %v660_v5, %s610_s10 }
  0x3a   :  { %157 = vrot.lane.b32.xlu1 %v663_v8, %s609_s9 }
  0x3c   :  { %227 = vrot.lane.b32.xlu0 %v660_v5, %s611_s11 }
  0x3e   :  { %172 = vrot.lane.b32.xlu1 %v660_v5, %s612_s14 }
  0x40   :  { %243 = vperm.xlu0 %533, %v238_v12  }
  0x42   :  { %174 = vrot.lane.b32.xlu1 %v663_v8, %s612_s14 }
  0x44   :  { %536 = vset.pattern.permute.xlu0 %v600_v6 }
  0x45   :  { %289 = vperm.xlu0 %536, %v238_v12  }
  0x46   :  { %193 = vrot.lane.b32.xlu1 %v663_v8, %s608_s8 }
  0x49   :  { %538 = vset.pattern.permute.xlu0 %v597_v1 }
  0x4a   :  { %210 = vrot.lane.b32.xlu1 %v663_v8, %s610_s10 }
  0x4e   :  { %229 = vrot.lane.b32.xlu1 %v663_v8, %s611_s11 }
  0x52   :  { %257 = vperm.xlu1 %534, %v238_v12  }
  0x56   :  { %535 = vset.pattern.permute.xlu1 %v598_v3 }
  0x57   :  { %273 = vperm.xlu1 %535, %v238_v12  }
  0x5b   :  { %537 = vset.pattern.permute.xlu1 %v597_v1 }
  0x5c   :  { %349 = vperm.xlu1 %537, %v239_v13  }
  0x60   :  { %356 = vperm.xlu1 %537, %v240_v14  }
  0x93   :  { %v115_v15 = vpop.permute.xlu1 %114  ;;  %v98_v17 = vpop.permute.xlu0 %97 }
  0x94   :  { %v100_v43 = vmul.f32 %v98_v17, %v94_v38  ;;  %v101_v44 = vmul.f32 %v499_v41, %v98_v17  ;;  %v117_v52 = vmul.f32 %v502_v37, %v115_v15 }
  0x98   :  { %v134_v16 = vpop.permute.xlu1 %133  ;;  %v90_v19 = vpop.permute.xlu0 %89 }
  0x99   :  { %v92_v55 = vmul.f32 %v90_v19, %v660_v5  ;;  %v93_v56 = vmul.f32 %v90_v19, %v663_v8  ;;  %v136_v61 = vmul.f32 %v134_v16, %v130_v46  ;;  %v137_v62 = vmul.f32 %v501_v49, %v134_v16 }
  0x9c   :  { %v103_v21 = vpop.permute.xlu0 %102 }
  0x9d   :  { %v689_v18 = vpop.permute.xlu1 %150 }
  0x9e   :  { %v153_v3 = vmul.f32 %v498_v33, %v689_v18  ;;  %v154_v4 = vmul.f32 %v499_v41, %v689_v18 }
  0xa0   :  { %v691_v25 = vpop.permute.xlu0 %167 }
  0xa1   :  { %v105_v20 = vpop.permute.xlu1 %104  ;;  %v170_v11 = vmul.f32 %v703_v39, %v691_v25  ;;  %v171_v12 = vmul.f32 %v501_v49, %v691_v25 }
  0xa2   :  { %v107_v47 = vsel %vm106_vm5, %v103_v21, %v105_v20  ;;  %v108_v48 = vsel %vm106_vm5, %v105_v20, %v103_v21 }
  0xa3   :  { %v109_v57 = vmul.f32 %v108_v48, %v100_v43  ;;  %v110_v58 = vmul.f32 %v107_v47, %v101_v44  ;;  %v247_v43 = vshrl.u32 %v35_v23, 7 }
  0xa5   :  { %v120_v22 = vpop.permute.xlu1 %119  ;;  %v697_v29 = vpop.permute.xlu0 %186  ;;  %v111_v7 = vadd.f32 %v109_v57, %v92_v55  ;;  %v112_v8 = vadd.f32 %v110_v58, %v93_v56  ;;  %v248_v56 = vsub.s32 0, %v247_v43  ;;  %v373_v26 = vsub.s32 4, %v247_v43 }
  0xa6   :  { %v189_v20 = vmul.f32 %v498_v33, %v697_v29  ;;  %v190_v21 = vmul.f32 %v697_v29, %v184_v50 }
  0xa9   :  { %v122_v24 = vpop.permute.xlu1 %121 }
  0xaa   :  { %v701_v35 = vpop.permute.xlu0 %203  ;;  %v124_v53 = vsel %vm123_vm7, %v120_v22, %v122_v24  ;;  %v125_v54 = vsel %vm123_vm7, %v122_v24, %v120_v22 }
  0xab   :  { %v126_v63 = vmul.f32 %v125_v54, %v117_v52  ;;  %v127_v0 = vmul.f32 %v124_v53, %v115_v15  ;;  %v207_v32 = vmul.f32 %v503_v42, %v701_v35 }
  0xad   :  { %v139_v27 = vpop.permute.xlu1 %138  ;;  %v128_v15 = vadd.f32 %v126_v63, %v111_v7  ;;  %v129_v16 = vadd.f32 %v127_v0, %v112_v8  ;;  %v294_v63 = vsub.s32 3, %v247_v43  ;;  %v278_v0 = vsub.s32 2, %v247_v43 }
  0xaf   :  { %v707_v45 = vpop.permute.xlu0 %222 }
  0xb0   :  { %v225_v48 = vmul.f32 %v703_v39, %v707_v45  ;;  %v226_v49 = vmul.f32 %v707_v45, %v220_v34  ;;  %v407_v39 = vsub.s32 7, %v247_v43  ;;  %v395_v45 = vsub.s32 6, %v247_v43 }
  0xb1   :  { %v141_v31 = vpop.permute.xlu1 %140 }
  0xb2   :  { %v143_v59 = vsel %vm142_vm8, %v139_v27, %v141_v31  ;;  %v144_v60 = vsel %vm142_vm8, %v141_v31, %v139_v27 }
  0xb3   :  { %v192_v1 = vpop.permute.xlu0 %191  ;;  %v145_v9 = vmul.f32 %v144_v60, %v136_v61  ;;  %v146_v10 = vmul.f32 %v143_v59, %v137_v62  ;;  %v262_v60 = vsub.s32 1, %v247_v43 }
  0xb5   :  { %v156_v36 = vpop.permute.xlu1 %155  ;;  %v147_v25 = vadd.f32 %v145_v9, %v128_v15  ;;  %v148_v27 = vadd.f32 %v146_v10, %v129_v16 }
  0xb7   :  { %v209_v28 = vpop.permute.xlu0 %208 }
  0xb9   :  { %v158_v40 = vpop.permute.xlu1 %157 }
  0xba   :  { %v160_v5 = vsel %vm159_vm9, %v156_v36, %v158_v40  ;;  %v161_v6 = vsel %vm159_vm9, %v158_v40, %v156_v36 }
  0xbb   :  { %v162_v17 = vmul.f32 %v161_v6, %v153_v3  ;;  %v163_v18 = vmul.f32 %v160_v5, %v154_v4  ;;  %v228_v50 = vpop.permute.xlu0 %227 }
  0xbd   :  { %v173_v51 = vpop.permute.xlu1 %172  ;;  %v164_v36 = vadd.f32 %v162_v17, %v147_v25  ;;  %v165_v37 = vadd.f32 %v163_v18, %v148_v27 }
  0xbf   :  { %v244_v6 = vpop.permute.xlu0 %243 }
  0xc1   :  { %v175_v2 = vpop.permute.xlu1 %174 }
  0xc2   :  { %v177_v13 = vsel %vm176_vm10, %v173_v51, %v175_v2  ;;  %v178_v14 = vsel %vm176_vm10, %v175_v2, %v173_v51 }
  0xc3   :  { %v179_v30 = vmul.f32 %v177_v13, %v170_v11  ;;  %v180_v31 = vmul.f32 %v178_v14, %v171_v12 }
  0xc5   :  { %v194_v19 = vpop.permute.xlu1 %193  ;;  %v181_v44 = vadd.f32 %v179_v30, %v164_v36  ;;  %v182_v46 = vadd.f32 %v180_v31, %v165_v37  ;;  %v290_v31 = vpop.permute.xlu0 %289 }
  0xc6   :  { %v196_v22 = vsel %vm195_vm11, %v192_v1, %v194_v19  ;;  %v197_v24 = vsel %vm195_vm11, %v194_v19, %v192_v1 }
  0xc7   :  { %v198_v38 = vmul.f32 %v196_v22, %v189_v20  ;;  %v199_v33 = vmul.f32 %v197_v24, %v190_v21 }
  0xc9   :  { %v211_v40 = vpop.permute.xlu1 %210  ;;  %v200_v51 = vadd.f32 %v198_v38, %v181_v44  ;;  %v201_v52 = vadd.f32 %v199_v33, %v182_v46 }
  0xca   :  { %v213_v29 = vsel %vm212_vm12, %v209_v28, %v211_v40  ;;  %v214_v41 = vsel %vm212_vm12, %v211_v40, %v209_v28 }
  0xcb   :  { %v215_v47 = vmul.f32 %v213_v29, %v701_v35  ;;  %v216_v42 = vmul.f32 %v214_v41, %v207_v32  ;;  %v383_v35 = vsub.s32 5, %v247_v43 }
  0xcd   :  { %v230_v53 = vpop.permute.xlu1 %229  ;;  %v217_v57 = vadd.f32 %v215_v47, %v200_v51  ;;  %v218_v23 = vadd.f32 %v216_v42, %v201_v52 }
  0xce   :  { %v232_v54 = vsel %vm231_vm13, %v228_v50, %v230_v53  ;;  %v233_v55 = vsel %vm231_vm13, %v230_v53, %v228_v50 }
  0xcf   :  { %v234_v58 = vmul.f32 %v232_v54, %v225_v48  ;;  %v235_v59 = vmul.f32 %v233_v55, %v226_v49 }
  0xd1   :  { %v236_v61 = vadd.f32 %v234_v58, %v217_v57  ;;  %v237_v62 = vadd.f32 %v235_v59, %v218_v23  ;;  %v258_v5 = vpop.permute.xlu1 %257 }
  0xd3   :  { %v253_v1 = vrot.slane %v237_v62, %v248_v56  ;;  %v378_v2 = vrot.slane %v237_v62, %v373_v26  ;;  %v249_v3 = vrot.slane %v236_v61, %v248_v56  ;;  %v374_v4 = vrot.slane %v236_v61, %v373_v26 }
  0xd4   :  { %v263_v7 = vrot.slane %v236_v61, %v262_v60  ;;  %v267_v8 = vrot.slane %v237_v62, %v262_v60  ;;  %v384_v9 = vrot.slane %v236_v61, %v383_v35  ;;  %v388_v10 = vrot.slane %v237_v62, %v383_v35 }
  0xd5   :  { %v254_v11 = vmul.f32 %v249_v3, %v244_v6  ;;  %v255_v12 = vmul.f32 %v253_v1, %v244_v6  ;;  %v379_v13 = vmul.f32 %v374_v4, %v244_v6  ;;  %v380_v14 = vmul.f32 %v378_v2, %v244_v6 }
  0xd6   :  { %v268_v15 = vmul.f32 %v263_v7, %v258_v5  ;;  %v269_v16 = vmul.f32 %v267_v8, %v258_v5  ;;  %v389_v17 = vmul.f32 %v384_v9, %v258_v5  ;;  %v390_v18 = vmul.f32 %v388_v10, %v258_v5  ;;  %v274_v30 = vpop.permute.xlu1 %273 }
  0xd7   :  { %v299_v19 = vrot.slane %v237_v62, %v294_v63  ;;  %v412_v20 = vrot.slane %v237_v62, %v407_v39  ;;  %v295_v21 = vrot.slane %v236_v61, %v294_v63  ;;  %v408_v22 = vrot.slane %v236_v61, %v407_v39 }
  0xd8   :  { %v270_v24 = vadd.f32 %v268_v15, %v254_v11  ;;  %v271_v25 = vadd.f32 %v269_v16, %v255_v12  ;;  %v391_v27 = vadd.f32 %v389_v17, %v379_v13  ;;  %v392_v28 = vadd.f32 %v390_v18, %v380_v14 }
  0xd9   :  { %v279_v32 = vrot.slane %v236_v61, %v278_v0  ;;  %v283_v34 = vrot.slane %v237_v62, %v278_v0  ;;  %v396_v36 = vrot.slane %v236_v61, %v395_v45  ;;  %v400_v37 = vrot.slane %v237_v62, %v395_v45 }
  0xda   :  { %v300_v41 = vmul.f32 %v295_v21, %v290_v31  ;;  %v301_v43 = vmul.f32 %v299_v19, %v290_v31  ;;  %v413_v44 = vmul.f32 %v408_v22, %v290_v31  ;;  %v414_v46 = vmul.f32 %v412_v20, %v290_v31 }
  0xdb   :  { %v284_v38 = vmul.f32 %v279_v32, %v274_v30  ;;  %v285_v33 = vmul.f32 %v283_v34, %v274_v30  ;;  %v401_v40 = vmul.f32 %v396_v36, %v274_v30  ;;  %v402_v29 = vmul.f32 %v400_v37, %v274_v30 }
  0xdd   :  { %v286_v47 = vadd.f32 %v284_v38, %v270_v24  ;;  %v287_v42 = vadd.f32 %v285_v33, %v271_v25  ;;  %v403_v48 = vadd.f32 %v401_v40, %v391_v27  ;;  %v404_v49 = vadd.f32 %v402_v29, %v392_v28 }
  0xdf   :  { %v302_v50 = vadd.f32 %v300_v41, %v286_v47  ;;  %v303_v51 = vadd.f32 %v301_v43, %v287_v42  ;;  %v415_v52 = vadd.f32 %v413_v44, %v403_v48  ;;  %v416_v53 = vadd.f32 %v414_v46, %v404_v49 }
  0xe1   :  { %v305_v54 = vsel %vm304_vm14, %v302_v50, 0.0  ;;  %v312_v55 = vsel %vm304_vm14, %v303_v51, 0.0  ;;  %v417_v56 = vsel %vm304_vm14, %v415_v52, 0.0  ;;  %v424_v26 = vsel %vm304_vm14, %v416_v53, 0.0 }
  0xe2   :  { %v306_v57 = vrot.slane %v305_v54, 4  ;;  %v313_v23 = vrot.slane %v312_v55, 4  ;;  %v418_v58 = vrot.slane %v417_v56, 4  ;;  %v425_v59 = vrot.slane %v424_v26, 4 }
  0xe4   :  { %v307_v60 = vadd.f32 %v306_v57, %v305_v54  ;;  %v314_v35 = vadd.f32 %v313_v23, %v312_v55  ;;  %v419_v61 = vadd.f32 %v418_v58, %v417_v56  ;;  %v426_v62 = vadd.f32 %v425_v59, %v424_v26 }
  0xe6   :  { %v308_v63 = vrot.slane %v307_v60, 2  ;;  %v315_v39 = vrot.slane %v314_v35, 2  ;;  %v420_v0 = vrot.slane %v419_v61, 2  ;;  %v427_v45 = vrot.slane %v426_v62, 2 }
  0xe8   :  { %v309_v1 = vadd.f32 %v308_v63, %v307_v60  ;;  %v316_v2 = vadd.f32 %v315_v39, %v314_v35  ;;  %v421_v3 = vadd.f32 %v420_v0, %v419_v61  ;;  %v428_v4 = vadd.f32 %v427_v45, %v426_v62  ;;  %v350_v63 = vpop.permute.xlu1 %349 }
  0xea   :  { %v310_v5 = vrot.slane %v309_v1, 1  ;;  %v317_v6 = vrot.slane %v316_v2, 1  ;;  %v422_v7 = vrot.slane %v421_v3, 1  ;;  %v429_v8 = vrot.slane %v428_v4, 1 }
  0xec   :  { %v311_v9 = vadd.f32 %v310_v5, %v309_v1  ;;  %v318_v10 = vadd.f32 %v317_v6, %v316_v2  ;;  %v423_v11 = vadd.f32 %v422_v7, %v421_v3  ;;  %v430_v12 = vadd.f32 %v429_v8, %v428_v4  ;;  %v357_v6 = vpop.permute.xlu1 %356 }
  0xee   :  { %v319_v13 = vmul.f32 0.25, %v311_v9  ;;  %v320_v14 = vmul.f32 0.25, %v318_v10  ;;  %v431_v15 = vmul.f32 0.25, %v423_v11  ;;  %v432_v16 = vmul.f32 0.25, %v430_v12 }
  0xf0   :  { %v321_v17 = vsub.f32 %v302_v50, %v319_v13  ;;  %v322_v18 = vsub.f32 %v303_v51, %v320_v14  ;;  %v433_v19 = vsub.f32 %v415_v52, %v431_v15  ;;  %v434_v20 = vsub.f32 %v416_v53, %v432_v16 }
  0xf2   :  { %v323_v21 = vmul.f32 %v321_v17, %v321_v17  ;;  %v324_v22 = vmul.f32 %v322_v18, %v322_v18  ;;  %v435_v24 = vmul.f32 %v433_v19, %v433_v19  ;;  %v436_v25 = vmul.f32 %v434_v20, %v434_v20 }
  0xf4   :  { %v325_v27 = vsel %vm304_vm14, %v323_v21, 0.0  ;;  %v332_v28 = vsel %vm304_vm14, %v324_v22, 0.0  ;;  %v437_v30 = vsel %vm304_vm14, %v435_v24, 0.0  ;;  %v444_v31 = vsel %vm304_vm14, %v436_v25, 0.0 }
  0xf5   :  { %v326_v32 = vrot.slane %v325_v27, 4  ;;  %v333_v34 = vrot.slane %v332_v28, 4  ;;  %v438_v36 = vrot.slane %v437_v30, 4  ;;  %v445_v37 = vrot.slane %v444_v31, 4 }
  0xf7   :  { %v327_v38 = vadd.f32 %v326_v32, %v325_v27  ;;  %v334_v33 = vadd.f32 %v333_v34, %v332_v28  ;;  %v439_v40 = vadd.f32 %v438_v36, %v437_v30  ;;  %v446_v29 = vadd.f32 %v445_v37, %v444_v31 }
  0xf9   :  { %v328_v41 = vrot.slane %v327_v38, 2  ;;  %v335_v43 = vrot.slane %v334_v33, 2  ;;  %v440_v44 = vrot.slane %v439_v40, 2  ;;  %v447_v46 = vrot.slane %v446_v29, 2 }
  0xfb   :  { %v329_v47 = vadd.f32 %v328_v41, %v327_v38  ;;  %v336_v42 = vadd.f32 %v335_v43, %v334_v33  ;;  %v441_v48 = vadd.f32 %v440_v44, %v439_v40  ;;  %v448_v49 = vadd.f32 %v447_v46, %v446_v29 }
  0xfd   :  { %v330_v50 = vrot.slane %v329_v47, 1  ;;  %v337_v51 = vrot.slane %v336_v42, 1  ;;  %v442_v52 = vrot.slane %v441_v48, 1  ;;  %v449_v53 = vrot.slane %v448_v49, 1 }
  0xff   :  { %v331_v54 = vadd.f32 %v330_v50, %v329_v47  ;;  %v338_v55 = vadd.f32 %v337_v51, %v336_v42  ;;  %v443_v56 = vadd.f32 %v442_v52, %v441_v48  ;;  %v450_v26 = vadd.f32 %v449_v53, %v448_v49 }
 0x101   :  { %v339_v57 = vmul.f32 0.25, %v331_v54  ;;  %v340_v23 = vmul.f32 0.25, %v338_v55  ;;  %v451_v58 = vmul.f32 0.25, %v443_v56  ;;  %v452_v59 = vmul.f32 0.25, %v450_v26 }
 0x103   :  { %v341_v60 = vadd.f32 1e-05, %v339_v57  ;;  %v342_v35 = vadd.f32 1e-05, %v340_v23  ;;  %v453_v61 = vadd.f32 1e-05, %v451_v58 }
 0x104   :  { %v454_v62 = vadd.f32 1e-05, %v452_v59 }
 0x105   :  { %539 = vrsqrt.f32 %v341_v60 }
 0x106   :  { %541 = vrsqrt.f32 %v342_v35 }
 0x107   :  { %543 = vrsqrt.f32 %v453_v61 }
 0x108   :  { %545 = vrsqrt.f32 %v454_v62 }
 0x10f   :  { %v540_v39 = vpop.eup %539 }
 0x110   :  { %v542_v0 = vpop.eup %541  ;;  %v345_v45 = vmul.f32 %v540_v39, %v321_v17 }
 0x111   :  { %v544_v1 = vpop.eup %543  ;;  %v346_v2 = vmul.f32 %v542_v0, %v322_v18 }
 0x112   :  { %v546_v3 = vpop.eup %545  ;;  %v352_v4 = vmul.f32 %v350_v63, %v345_v45  ;;  %v457_v5 = vmul.f32 %v544_v1, %v433_v19 }
 0x113   :  { %v353_v7 = vmul.f32 %v350_v63, %v346_v2  ;;  %v458_v8 = vmul.f32 %v546_v3, %v434_v20 }
 0x114   :  { %v359_v9 = vadd.f32 %v357_v6, %v352_v4  ;;  %v459_v10 = vmul.f32 %v457_v5, %v350_v63 }
 0x115   :  { %v360_v11 = vadd.f32 %v357_v6, %v353_v7  ;;  %v460_v12 = vmul.f32 %v458_v8, %v350_v63 }
 0x116   :  { %v361_v13 = vadd.f32 3.0, %v359_v9  ;;  %v461_v14 = vadd.f32 %v459_v10, %v357_v6 }
 0x117   :  { %v362_v15 = vadd.f32 3.0, %v360_v11  ;;  %v462_v16 = vadd.f32 %v460_v12, %v357_v6 }
 0x118   :  { %v363_v21 = vmax.f32 %v361_v13, 0.0  ;;  %v463_v22 = vadd.f32 3.0, %v461_v14 }
 0x119   :  { %v364_v24 = vmax.f32 %v362_v15, 0.0  ;;  %v464_v17 = vadd.f32 3.0, %v462_v16 }
 0x11a   :  { %v365_v25 = vmin.f32 %v363_v21, 6.0  ;;  %v465_v18 = vmax.f32 %v463_v22, 0.0 }
 0x11b   :  { %v366_v27 = vmin.f32 %v364_v24, 6.0  ;;  %v466_v28 = vmax.f32 %v464_v17, 0.0 }
 0x11c   :  { %v467_v19 = vmin.f32 %v465_v18, 6.0  ;;  %v367_v31 = vmul.f32 %v365_v25, %v359_v9 }
 0x11d   :  { %v468_v30 = vmin.f32 %v466_v28, 6.0  ;;  %v368_v32 = vmul.f32 %v366_v27, %v360_v11 }
 0x11e   :  { %v469_v20 = vmul.f32 %v467_v19, %v461_v14  ;;  %v369_v38 = vmul.f32 0.16666667, %v367_v31 }
 0x11f   :  { %v470_v34 = vmul.f32 %v468_v30, %v462_v16  ;;  %v370_v40 = vmul.f32 0.16666667, %v368_v32 }
 0x120   :  { %v471_v36 = vmul.f32 0.16666667, %v469_v20 }
 0x121   :  { %v472_v37 = vmul.f32 0.16666667, %v470_v34 }
 0x122   :  { %v475_v33 = vrot.slane %v471_v36, 4 }
 0x123   :  { %v476_v29 = vrot.slane %v472_v37, 4 }
 0x124   :  { %v479_v41 = vsel %vm304_vm14, %v369_v38, %v475_v33 }
 0x125   :  { %v480_v43 = vsel %vm304_vm14, %v370_v40, %v476_v29  ;;  %481 = vst [vmem:[#allocation5] sm:$0xff] %v479_v41 }
 0x126   :  { %482 = vst [vmem:[#allocation5 + $0x8] sm:$0xff] %v480_v43 }
 0x127   :  { %580 = shalt.err (!%p577_p12)
}
 0x128   :  { %s581_s21 = scalar_lea.hbm %s774_s5, 256 }
 0x129   :  { %p582_p13 = scmp.ne.s32.totalorder %s774_s5, %s581_s21  ;;  %p585_p0 = scmp.lt.u32.totalorder %s581_s21, %s774_s5 }
 0x12b   :  { %p587_p1 = pnand %p585_p0, %p582_p13 }
 0x12d   :  { %590 = shalt.err (!%p587_p1)
}
 0x12e   :  { %492 = dma.vmem_to_hbm [thread:$0]  %s490_s4, 256, %s774_s5, [#allocation4]  }
 0x12f   :  { %593 = dma.done.wait [#allocation4], 256  }
 0x130   :  { %594 = vsyncadd [#allocation4], 4294967040 }
 0x131   :  { %496 = vsyncpa [#allocation3], 1 }
 0x132   :  { %497 = vsyncpa [#allocation4], 1 }

</bundles_post_ra>
